<compile_context>
chip_gen: v6e
topology: v6e:2x2x1
jax: 0.10.0
libtpu: 0.0.40
codegen_flags: <defaults>
</compile_context>

<pallas_src>
import functools

import jax
import jax.numpy as jnp
from jax import lax
from jax.experimental import pallas as pl
from jax.experimental.pallas import tpu as pltpu

_BN_EPS = 1e-5
_LANE = 128
_SUBLANE = 8


def _conv1x1(w, x, *, use_mxu):
    """(Co,Ci) @ (Ci,L).  VPU broadcast-FMA for tiny Ci, MXU otherwise."""
    if use_mxu:
        # TODO(synk): for realistic ShuffleNet widths re-check tolerance at
        # DEFAULT matmul precision (review: DEFAULT/HIGH, not HIGHEST).
        return jnp.dot(w, x, preferred_element_type=jnp.float32)
    ci = w.shape[1]
    acc = w[:, 0:1] * x[0:1, :]
    for c in range(1, ci):
        acc = acc + w[:, c:c + 1] * x[c:c + 1, :]
    return acc


def _branch_kernel(x_ref, m_ref, w1_ref, b1_ref, wd_ref, b2_ref,
                   w2_ref, b3_ref, o_ref, *, wp, lanes, use_mxu):
    """Right branch (1x1+BN+ReLU -> dw3x3+BN -> 1x1+BN+ReLU) on one lane-packed block.

    x_ref : (Cp, Lb)  Nb images packed along lanes; each Lp-segment is
                      [guard zeros | zero-padded HpxWp frame | tail zeros].
    m_ref : (1, Lb)   1.0 on true (unpadded) pixels, 0.0 elsewhere.
    w1/w2 : (Cp, Cp)  BN-scale-folded 1x1 conv weights, (cout, cin).
    wd    : (Cp, 9)   BN-scale-folded depthwise 3x3 weights, taps along lanes.
    b1/2/3: (Cp, 1)   folded BatchNorm biases.
    o_ref : (Cp, Lb)  lane-dense branch output (guard/tail lanes are junk and
                      get sliced off by the wrapper).
    """
    x = x_ref[...].astype(jnp.float32)
    m = m_ref[...]

    # ---- conv1x1 #1 + BN + ReLU -------------------------------------------
    y = _conv1x1(w1_ref[...], x, use_mxu=use_mxu)
    # Mask re-establishes the exact zero ring/guards the 3x3 padding needs
    # (padded lanes would otherwise carry relu(b1)).
    y = jnp.maximum(y + b1_ref[...], 0.0) * m

    # ---- depthwise 3x3 + BN: 9 whole-width lane rotations (XLU) + VPU FMAs --
    wd = wd_ref[...]
    acc = y * wd[:, 4:5]                      # centre tap, offset 0
    for k in range(9):
        if k == 4:
            continue
        ky, kx = divmod(k, 3)
        off = (ky - 1) * wp + (kx - 1)        # |off| <= wp + 1 = guard
        shift = (-off) % lanes                # rolled[p] = y[p + off]
        acc = acc + pltpu.roll(y, shift, axis=1) * wd[:, k:k + 1]
    z = acc + b2_ref[...]

    # ---- conv1x1 #2 + BN + ReLU --------------------------------------------
    o = _conv1x1(w2_ref[...], z, use_mxu=use_mxu)
    o_ref[...] = jnp.maximum(o + b3_ref[...], 0.0).astype(o_ref.dtype)


def _fold_bn(gamma, beta, mean, var, eps=_BN_EPS):
    scale = gamma / jnp.sqrt(var + eps)
    return scale, beta - mean * scale


@jax.jit
def shuffle_unit_v2_s1(x, params):
    """Forward pass of ShuffleUnitV2S1.  x: (N, C, H, W) NCHW, C even."""
    N, Cfull, H, W = x.shape
    C = Cfull // 2
    Cp = _SUBLANE * pl.cdiv(C, _SUBLANE)              # sublane-padded channels
    Hp, Wp = H + 2, W + 2
    frame = Hp * Wp                                   # flattened padded frame
    guard = Wp + 1                                    # largest |tap offset|
    Lp = _LANE * pl.cdiv(frame + 2 * guard, _LANE)    # lane-aligned segment
    assert Lp >= frame + 2 * guard                    # taps never cross images

    # --- images per grid step: stream ~0.5 MiB/step; keep >=2 parallel blocks
    #     (v7x has 2 TCs) only once each block is non-trivially sized. --------
    per_img = Cp * Lp * 4
    nb = max(1, min(N, (512 * 1024) // per_img))
    if N * per_img >= 2 * 128 * 1024:
        nb = min(nb, -(-N // 2))
    G = -(-N // nb)
    Npad = G * nb
    Lb = nb * Lp

    # channel_split
    x1, x2 = x[:, :C], x[:, C:]

    # Right-branch input: spatial zero-pad, flatten, lane guards, channel pad,
    # then pack nb images per block along the lane axis (lane-dense tiles).
    x2f = jnp.pad(x2, ((0, 0), (0, 0), (1, 1), (1, 1))).reshape(N, C, frame)
    x_ext = jnp.pad(x2f.astype(jnp.float32),
                    ((0, 0), (0, Cp - C), (guard, Lp - guard - frame)))
    x_ext = jnp.pad(x_ext, ((0, Npad - N), (0, 0), (0, 0)))
    x_blk = (x_ext.reshape(G, nb, Cp, Lp)
                  .transpose(0, 2, 1, 3)
                  .reshape(G, Cp, Lb))

    # interior mask on the packed lane axis (constant-folded under jit)
    m2d = jnp.pad(jnp.ones((H, W), jnp.float32), ((1, 1), (1, 1)))
    mask = jnp.pad(m2d.reshape(1, frame), ((0, 0), (guard, Lp - guard - frame)))
    mask = jnp.tile(mask, (1, nb))

    # Fold BatchNorm (inference running stats) into conv weights; pad channels.
    s1, b1 = _fold_bn(*params["bn1"])
    s2, b2 = _fold_bn(*params["bn2"])
    s3, b3 = _fold_bn(*params["bn3"])

    def padmat(w):            # (C, C) -> (Cp, Cp)
        return jnp.pad(w, ((0, Cp - C), (0, Cp - C)))

    def padcol(v):            # (C,) -> (Cp, 1)
        return jnp.pad(v, (0, Cp - C)).reshape(Cp, 1)

    w1s = padmat(params["conv1_w"][:, :, 0, 0] * s1[:, None])
    w2s = padmat(params["conv2_w"][:, :, 0, 0] * s3[:, None])
    wds = jnp.pad(params["dw_w"][:, 0].reshape(C, 9) * s2[:, None],
                  ((0, Cp - C), (0, 0)))              # (Cp, 9) all taps resident
    b1c, b2c, b3c = padcol(b1), padcol(b2), padcol(b3)

    kernel = functools.partial(_branch_kernel, wp=Wp, lanes=Lb,
                               use_mxu=(Cp > 8))
    const2 = lambda g: (0, 0)

    out_blk = pl.pallas_call(
        kernel,
        out_shape=jax.ShapeDtypeStruct((G, Cp, Lb), jnp.float32),
        grid=(G,),
        in_specs=[
            pl.BlockSpec((None, Cp, Lb), lambda g: (g, 0, 0)),   # packed images
            pl.BlockSpec((1, Lb), const2),                       # mask
            pl.BlockSpec((Cp, Cp), const2),                      # w1 (folded)
            pl.BlockSpec((Cp, 1), const2),                       # b1
            pl.BlockSpec((Cp, 9), const2),                       # dw weights
            pl.BlockSpec((Cp, 1), const2),                       # b2
            pl.BlockSpec((Cp, Cp), const2),                      # w2 (folded)
            pl.BlockSpec((Cp, 1), const2),                       # b3
        ],
        out_specs=pl.BlockSpec((None, Cp, Lb), lambda g: (g, 0, 0)),
        compiler_params=pltpu.CompilerParams(
            dimension_semantics=("parallel",)),
    )(x_blk, mask, w1s, b1c, wds, b2c, w2s, b3c)

    # Unpack lane-dense blocks back to (N, C, H, W) interior (layout glue).
    out_ext = (out_blk.reshape(G, Cp, nb, Lp)
                      .transpose(0, 2, 1, 3)
                      .reshape(Npad, Cp, Lp))
    out2 = (out_ext[:N, :C, guard:guard + frame]
            .reshape(N, C, Hp, Wp)[:, :, 1:-1, 1:-1]
            .astype(x.dtype))

    # concat + channel_shuffle(groups=2)
    out = jnp.concatenate([x1, out2], axis=1)
    out = (out.reshape(N, 2, C, H, W)
              .transpose(0, 2, 1, 3, 4)
              .reshape(N, Cfull, H, W))
    return out


def init_params(key, inp):
    """Deterministic synthetic parameters matching the PyTorch module shapes."""
    k1, k2, k3, kb1, kb2, kb3 = jax.random.split(key, 6)

    def bn(k):
        kg, kb, km, kv = jax.random.split(k, 4)
        gamma = 1.0 + 0.1 * jax.random.normal(kg, (inp,), jnp.float32)
        beta = 0.1 * jax.random.normal(kb, (inp,), jnp.float32)
        mean = 0.1 * jax.random.normal(km, (inp,), jnp.float32)
        var = jax.random.uniform(kv, (inp,), jnp.float32, 0.5, 1.5)
        return gamma, beta, mean, var

    return dict(
        conv1_w=0.3 * jax.random.normal(k1, (inp, inp, 1, 1), jnp.float32),
        dw_w=0.3 * jax.random.normal(k2, (inp, 1, 3, 3), jnp.float32),
        conv2_w=0.3 * jax.random.normal(k3, (inp, inp, 1, 1), jnp.float32),
        bn1=bn(kb1), bn2=bn(kb2), bn3=bn(kb3),
    )


def reference(x, p, eps=_BN_EPS):
    """Pure-JAX (XLA conv) reference mirroring the PyTorch forward."""
    N, Cf, H, W = x.shape
    inp = Cf // 2
    x1, x2 = x[:, :inp], x[:, inp:]

    def bn_apply(y, bnp):
        g, b, m, v = bnp
        g, b, m, v = (t[None, :, None, None] for t in (g, b, m, v))
        return (y - m) / jnp.sqrt(v + eps) * g + b

    dn = ("NCHW", "OIHW", "NCHW")
    hp = lax.Precision.HIGHEST
    y = lax.conv_general_dilated(x2, p["conv1_w"], (1, 1), "VALID",
                                 dimension_numbers=dn, precision=hp)
    y = jax.nn.relu(bn_apply(y, p["bn1"]))
    y = lax.conv_general_dilated(y, p["dw_w"], (1, 1), ((1, 1), (1, 1)),
                                 dimension_numbers=dn, feature_group_count=inp,
                                 precision=hp)
    y = bn_apply(y, p["bn2"])
    y = lax.conv_general_dilated(y, p["conv2_w"], (1, 1), "VALID",
                                 dimension_numbers=dn, precision=hp)
    y = jax.nn.relu(bn_apply(y, p["bn3"]))

    out = jnp.concatenate([x1, y], axis=1)
    out = (out.reshape(N, 2, inp, H, W)
              .transpose(0, 2, 1, 3, 4)
              .reshape(N, Cf, H, W))
    return out


if __name__ == "__main__":
    key = jax.random.PRNGKey(0)
    kx, kp = jax.random.split(key)

    N, Cfull, H, W = 2, 8, 16, 16          # in_channels == out_channels == 8
    x = jax.random.normal(kx, (N, Cfull, H, W), jnp.float32)
    params = init_params(kp, Cfull // 2)

    out = shuffle_unit_v2_s1(x, params)
    out = jax.block_until_ready(out)

    ref = reference(x, params)
    assert out.shape == (N, Cfull, H, W), out.shape
    if not jnp.allclose(out, ref, atol=5e-4, rtol=5e-4):
        raise AssertionError(
            f"kernel/reference mismatch, max err = {jnp.max(jnp.abs(out - ref))}")

    print("KERNEL_OK")
</pallas_src>

<mosaic_0001>
module attributes {stable_mosaic.version = 11 : i64} {
  func.func @_branch_kernel(%arg0: i32, %arg1: memref<1x8x768xf32, #tpu.memory_space<vmem>>, %arg2: memref<1x768xf32, #tpu.memory_space<vmem>>, %arg3: memref<8x8xf32, #tpu.memory_space<vmem>>, %arg4: memref<8x1xf32, #tpu.memory_space<vmem>>, %arg5: memref<8x9xf32, #tpu.memory_space<vmem>>, %arg6: memref<8x1xf32, #tpu.memory_space<vmem>>, %arg7: memref<8x8xf32, #tpu.memory_space<vmem>>, %arg8: memref<8x1xf32, #tpu.memory_space<vmem>>, %arg9: memref<1x8x768xf32, #tpu.memory_space<vmem>>) attributes {dimension_semantics = [#tpu.dimension_semantics<parallel>], iteration_bounds = array<i64: 1>, scalar_prefetch = 0 : i64, scratch_operands = 0 : i64, tpu.core_type = #tpu.core_type<tc>, window_params = [{transform_indices = @transform_0, window_bounds = array<i64: 1, 8, 768>}, {pipeline_mode = #tpu.pipeline_mode<synchronous>, transform_indices = @transform_1, window_bounds = array<i64: 1, 768>}, {pipeline_mode = #tpu.pipeline_mode<synchronous>, transform_indices = @transform_2, window_bounds = array<i64: 8, 8>}, {pipeline_mode = #tpu.pipeline_mode<synchronous>, transform_indices = @transform_3, window_bounds = array<i64: 8, 1>}, {pipeline_mode = #tpu.pipeline_mode<synchronous>, transform_indices = @transform_4, window_bounds = array<i64: 8, 9>}, {pipeline_mode = #tpu.pipeline_mode<synchronous>, transform_indices = @transform_5, window_bounds = array<i64: 8, 1>}, {pipeline_mode = #tpu.pipeline_mode<synchronous>, transform_indices = @transform_6, window_bounds = array<i64: 8, 8>}, {pipeline_mode = #tpu.pipeline_mode<synchronous>, transform_indices = @transform_7, window_bounds = array<i64: 8, 1>}, {transform_indices = @transform_8, window_bounds = array<i64: 1, 8, 768>}]} {
    %c0 = arith.constant 0 : index
    %c0_0 = arith.constant 0 : index
    %c0_1 = arith.constant 0 : index
    %0 = vector.load %arg1[%c0, %c0_0, %c0_1] : memref<1x8x768xf32, #tpu.memory_space<vmem>>, vector<1x8x768xf32>
    %1 = vector.shape_cast %0 : vector<1x8x768xf32> to vector<8x768xf32>
    %c0_2 = arith.constant 0 : index
    %c0_3 = arith.constant 0 : index
    %2 = vector.load %arg2[%c0_2, %c0_3] : memref<1x768xf32, #tpu.memory_space<vmem>>, vector<1x768xf32>
    %c0_4 = arith.constant 0 : index
    %c0_5 = arith.constant 0 : index
    %3 = vector.load %arg3[%c0_4, %c0_5] : memref<8x8xf32, #tpu.memory_space<vmem>>, vector<8x8xf32>
    %4 = vector.extract_strided_slice %3 {offsets = [0, 0], sizes = [8, 1], strides = [1, 1]} : vector<8x8xf32> to vector<8x1xf32>
    %5 = vector.extract_strided_slice %1 {offsets = [0, 0], sizes = [1, 768], strides = [1, 1]} : vector<8x768xf32> to vector<1x768xf32>
    %6 = vector.broadcast %4 : vector<8x1xf32> to vector<8x768xf32>
    %7 = vector.broadcast %5 : vector<1x768xf32> to vector<8x768xf32>
    %8 = arith.mulf %6, %7 : vector<8x768xf32>
    %9 = vector.extract_strided_slice %3 {offsets = [0, 1], sizes = [8, 1], strides = [1, 1]} : vector<8x8xf32> to vector<8x1xf32>
    %10 = vector.extract_strided_slice %1 {offsets = [1, 0], sizes = [1, 768], strides = [1, 1]} : vector<8x768xf32> to vector<1x768xf32>
    %11 = vector.broadcast %9 : vector<8x1xf32> to vector<8x768xf32>
    %12 = vector.broadcast %10 : vector<1x768xf32> to vector<8x768xf32>
    %13 = arith.mulf %11, %12 : vector<8x768xf32>
    %14 = arith.addf %8, %13 : vector<8x768xf32>
    %15 = vector.extract_strided_slice %3 {offsets = [0, 2], sizes = [8, 1], strides = [1, 1]} : vector<8x8xf32> to vector<8x1xf32>
    %16 = vector.extract_strided_slice %1 {offsets = [2, 0], sizes = [1, 768], strides = [1, 1]} : vector<8x768xf32> to vector<1x768xf32>
    %17 = vector.broadcast %15 : vector<8x1xf32> to vector<8x768xf32>
    %18 = vector.broadcast %16 : vector<1x768xf32> to vector<8x768xf32>
    %19 = arith.mulf %17, %18 : vector<8x768xf32>
    %20 = arith.addf %14, %19 : vector<8x768xf32>
    %21 = vector.extract_strided_slice %3 {offsets = [0, 3], sizes = [8, 1], strides = [1, 1]} : vector<8x8xf32> to vector<8x1xf32>
    %22 = vector.extract_strided_slice %1 {offsets = [3, 0], sizes = [1, 768], strides = [1, 1]} : vector<8x768xf32> to vector<1x768xf32>
    %23 = vector.broadcast %21 : vector<8x1xf32> to vector<8x768xf32>
    %24 = vector.broadcast %22 : vector<1x768xf32> to vector<8x768xf32>
    %25 = arith.mulf %23, %24 : vector<8x768xf32>
    %26 = arith.addf %20, %25 : vector<8x768xf32>
    %27 = vector.extract_strided_slice %3 {offsets = [0, 4], sizes = [8, 1], strides = [1, 1]} : vector<8x8xf32> to vector<8x1xf32>
    %28 = vector.extract_strided_slice %1 {offsets = [4, 0], sizes = [1, 768], strides = [1, 1]} : vector<8x768xf32> to vector<1x768xf32>
    %29 = vector.broadcast %27 : vector<8x1xf32> to vector<8x768xf32>
    %30 = vector.broadcast %28 : vector<1x768xf32> to vector<8x768xf32>
    %31 = arith.mulf %29, %30 : vector<8x768xf32>
    %32 = arith.addf %26, %31 : vector<8x768xf32>
    %33 = vector.extract_strided_slice %3 {offsets = [0, 5], sizes = [8, 1], strides = [1, 1]} : vector<8x8xf32> to vector<8x1xf32>
    %34 = vector.extract_strided_slice %1 {offsets = [5, 0], sizes = [1, 768], strides = [1, 1]} : vector<8x768xf32> to vector<1x768xf32>
    %35 = vector.broadcast %33 : vector<8x1xf32> to vector<8x768xf32>
    %36 = vector.broadcast %34 : vector<1x768xf32> to vector<8x768xf32>
    %37 = arith.mulf %35, %36 : vector<8x768xf32>
    %38 = arith.addf %32, %37 : vector<8x768xf32>
    %39 = vector.extract_strided_slice %3 {offsets = [0, 6], sizes = [8, 1], strides = [1, 1]} : vector<8x8xf32> to vector<8x1xf32>
    %40 = vector.extract_strided_slice %1 {offsets = [6, 0], sizes = [1, 768], strides = [1, 1]} : vector<8x768xf32> to vector<1x768xf32>
    %41 = vector.broadcast %39 : vector<8x1xf32> to vector<8x768xf32>
    %42 = vector.broadcast %40 : vector<1x768xf32> to vector<8x768xf32>
    %43 = arith.mulf %41, %42 : vector<8x768xf32>
    %44 = arith.addf %38, %43 : vector<8x768xf32>
    %45 = vector.extract_strided_slice %3 {offsets = [0, 7], sizes = [8, 1], strides = [1, 1]} : vector<8x8xf32> to vector<8x1xf32>
    %46 = vector.extract_strided_slice %1 {offsets = [7, 0], sizes = [1, 768], strides = [1, 1]} : vector<8x768xf32> to vector<1x768xf32>
    %47 = vector.broadcast %45 : vector<8x1xf32> to vector<8x768xf32>
    %48 = vector.broadcast %46 : vector<1x768xf32> to vector<8x768xf32>
    %49 = arith.mulf %47, %48 : vector<8x768xf32>
    %50 = arith.addf %44, %49 : vector<8x768xf32>
    %c0_6 = arith.constant 0 : index
    %c0_7 = arith.constant 0 : index
    %51 = vector.load %arg4[%c0_6, %c0_7] : memref<8x1xf32, #tpu.memory_space<vmem>>, vector<8x1xf32>
    %52 = vector.broadcast %51 : vector<8x1xf32> to vector<8x768xf32>
    %53 = arith.addf %50, %52 : vector<8x768xf32>
    %cst = arith.constant 0.000000e+00 : f32
    %54 = vector.broadcast %cst : f32 to vector<8x768xf32>
    %55 = arith.maximumf %53, %54 : vector<8x768xf32>
    %56 = vector.broadcast %2 : vector<1x768xf32> to vector<8x768xf32>
    %57 = arith.mulf %55, %56 : vector<8x768xf32>
    %c0_8 = arith.constant 0 : index
    %c0_9 = arith.constant 0 : index
    %58 = vector.load %arg5[%c0_8, %c0_9] : memref<8x9xf32, #tpu.memory_space<vmem>>, vector<8x9xf32>
    %59 = vector.extract_strided_slice %58 {offsets = [0, 4], sizes = [8, 1], strides = [1, 1]} : vector<8x9xf32> to vector<8x1xf32>
    %60 = vector.broadcast %59 : vector<8x1xf32> to vector<8x768xf32>
    %61 = arith.mulf %57, %60 : vector<8x768xf32>
    %c19_i32 = arith.constant 19 : i32
    %62 = tpu.dynamic_rotate %57 by %c19_i32 dim 1 : vector<8x768xf32>, i32 -> vector<8x768xf32>
    %63 = vector.extract_strided_slice %58 {offsets = [0, 0], sizes = [8, 1], strides = [1, 1]} : vector<8x9xf32> to vector<8x1xf32>
    %64 = vector.broadcast %63 : vector<8x1xf32> to vector<8x768xf32>
    %65 = arith.mulf %62, %64 : vector<8x768xf32>
    %66 = arith.addf %61, %65 : vector<8x768xf32>
    %c18_i32 = arith.constant 18 : i32
    %67 = tpu.dynamic_rotate %57 by %c18_i32 dim 1 : vector<8x768xf32>, i32 -> vector<8x768xf32>
    %68 = vector.extract_strided_slice %58 {offsets = [0, 1], sizes = [8, 1], strides = [1, 1]} : vector<8x9xf32> to vector<8x1xf32>
    %69 = vector.broadcast %68 : vector<8x1xf32> to vector<8x768xf32>
    %70 = arith.mulf %67, %69 : vector<8x768xf32>
    %71 = arith.addf %66, %70 : vector<8x768xf32>
    %c17_i32 = arith.constant 17 : i32
    %72 = tpu.dynamic_rotate %57 by %c17_i32 dim 1 : vector<8x768xf32>, i32 -> vector<8x768xf32>
    %73 = vector.extract_strided_slice %58 {offsets = [0, 2], sizes = [8, 1], strides = [1, 1]} : vector<8x9xf32> to vector<8x1xf32>
    %74 = vector.broadcast %73 : vector<8x1xf32> to vector<8x768xf32>
    %75 = arith.mulf %72, %74 : vector<8x768xf32>
    %76 = arith.addf %71, %75 : vector<8x768xf32>
    %c1_i32 = arith.constant 1 : i32
    %77 = tpu.dynamic_rotate %57 by %c1_i32 dim 1 : vector<8x768xf32>, i32 -> vector<8x768xf32>
    %78 = vector.extract_strided_slice %58 {offsets = [0, 3], sizes = [8, 1], strides = [1, 1]} : vector<8x9xf32> to vector<8x1xf32>
    %79 = vector.broadcast %78 : vector<8x1xf32> to vector<8x768xf32>
    %80 = arith.mulf %77, %79 : vector<8x768xf32>
    %81 = arith.addf %76, %80 : vector<8x768xf32>
    %c767_i32 = arith.constant 767 : i32
    %82 = tpu.dynamic_rotate %57 by %c767_i32 dim 1 : vector<8x768xf32>, i32 -> vector<8x768xf32>
    %83 = vector.extract_strided_slice %58 {offsets = [0, 5], sizes = [8, 1], strides = [1, 1]} : vector<8x9xf32> to vector<8x1xf32>
    %84 = vector.broadcast %83 : vector<8x1xf32> to vector<8x768xf32>
    %85 = arith.mulf %82, %84 : vector<8x768xf32>
    %86 = arith.addf %81, %85 : vector<8x768xf32>
    %c751_i32 = arith.constant 751 : i32
    %87 = tpu.dynamic_rotate %57 by %c751_i32 dim 1 : vector<8x768xf32>, i32 -> vector<8x768xf32>
    %88 = vector.extract_strided_slice %58 {offsets = [0, 6], sizes = [8, 1], strides = [1, 1]} : vector<8x9xf32> to vector<8x1xf32>
    %89 = vector.broadcast %88 : vector<8x1xf32> to vector<8x768xf32>
    %90 = arith.mulf %87, %89 : vector<8x768xf32>
    %91 = arith.addf %86, %90 : vector<8x768xf32>
    %c750_i32 = arith.constant 750 : i32
    %92 = tpu.dynamic_rotate %57 by %c750_i32 dim 1 : vector<8x768xf32>, i32 -> vector<8x768xf32>
    %93 = vector.extract_strided_slice %58 {offsets = [0, 7], sizes = [8, 1], strides = [1, 1]} : vector<8x9xf32> to vector<8x1xf32>
    %94 = vector.broadcast %93 : vector<8x1xf32> to vector<8x768xf32>
    %95 = arith.mulf %92, %94 : vector<8x768xf32>
    %96 = arith.addf %91, %95 : vector<8x768xf32>
    %c749_i32 = arith.constant 749 : i32
    %97 = tpu.dynamic_rotate %57 by %c749_i32 dim 1 : vector<8x768xf32>, i32 -> vector<8x768xf32>
    %98 = vector.extract_strided_slice %58 {offsets = [0, 8], sizes = [8, 1], strides = [1, 1]} : vector<8x9xf32> to vector<8x1xf32>
    %99 = vector.broadcast %98 : vector<8x1xf32> to vector<8x768xf32>
    %100 = arith.mulf %97, %99 : vector<8x768xf32>
    %101 = arith.addf %96, %100 : vector<8x768xf32>
    %c0_10 = arith.constant 0 : index
    %c0_11 = arith.constant 0 : index
    %102 = vector.load %arg6[%c0_10, %c0_11] : memref<8x1xf32, #tpu.memory_space<vmem>>, vector<8x1xf32>
    %103 = vector.broadcast %102 : vector<8x1xf32> to vector<8x768xf32>
    %104 = arith.addf %101, %103 : vector<8x768xf32>
    %c0_12 = arith.constant 0 : index
    %c0_13 = arith.constant 0 : index
    %105 = vector.load %arg7[%c0_12, %c0_13] : memref<8x8xf32, #tpu.memory_space<vmem>>, vector<8x8xf32>
    %106 = vector.extract_strided_slice %105 {offsets = [0, 0], sizes = [8, 1], strides = [1, 1]} : vector<8x8xf32> to vector<8x1xf32>
    %107 = vector.extract_strided_slice %104 {offsets = [0, 0], sizes = [1, 768], strides = [1, 1]} : vector<8x768xf32> to vector<1x768xf32>
    %108 = vector.broadcast %106 : vector<8x1xf32> to vector<8x768xf32>
    %109 = vector.broadcast %107 : vector<1x768xf32> to vector<8x768xf32>
    %110 = arith.mulf %108, %109 : vector<8x768xf32>
    %111 = vector.extract_strided_slice %105 {offsets = [0, 1], sizes = [8, 1], strides = [1, 1]} : vector<8x8xf32> to vector<8x1xf32>
    %112 = vector.extract_strided_slice %104 {offsets = [1, 0], sizes = [1, 768], strides = [1, 1]} : vector<8x768xf32> to vector<1x768xf32>
    %113 = vector.broadcast %111 : vector<8x1xf32> to vector<8x768xf32>
    %114 = vector.broadcast %112 : vector<1x768xf32> to vector<8x768xf32>
    %115 = arith.mulf %113, %114 : vector<8x768xf32>
    %116 = arith.addf %110, %115 : vector<8x768xf32>
    %117 = vector.extract_strided_slice %105 {offsets = [0, 2], sizes = [8, 1], strides = [1, 1]} : vector<8x8xf32> to vector<8x1xf32>
    %118 = vector.extract_strided_slice %104 {offsets = [2, 0], sizes = [1, 768], strides = [1, 1]} : vector<8x768xf32> to vector<1x768xf32>
    %119 = vector.broadcast %117 : vector<8x1xf32> to vector<8x768xf32>
    %120 = vector.broadcast %118 : vector<1x768xf32> to vector<8x768xf32>
    %121 = arith.mulf %119, %120 : vector<8x768xf32>
    %122 = arith.addf %116, %121 : vector<8x768xf32>
    %123 = vector.extract_strided_slice %105 {offsets = [0, 3], sizes = [8, 1], strides = [1, 1]} : vector<8x8xf32> to vector<8x1xf32>
    %124 = vector.extract_strided_slice %104 {offsets = [3, 0], sizes = [1, 768], strides = [1, 1]} : vector<8x768xf32> to vector<1x768xf32>
    %125 = vector.broadcast %123 : vector<8x1xf32> to vector<8x768xf32>
    %126 = vector.broadcast %124 : vector<1x768xf32> to vector<8x768xf32>
    %127 = arith.mulf %125, %126 : vector<8x768xf32>
    %128 = arith.addf %122, %127 : vector<8x768xf32>
    %129 = vector.extract_strided_slice %105 {offsets = [0, 4], sizes = [8, 1], strides = [1, 1]} : vector<8x8xf32> to vector<8x1xf32>
    %130 = vector.extract_strided_slice %104 {offsets = [4, 0], sizes = [1, 768], strides = [1, 1]} : vector<8x768xf32> to vector<1x768xf32>
    %131 = vector.broadcast %129 : vector<8x1xf32> to vector<8x768xf32>
    %132 = vector.broadcast %130 : vector<1x768xf32> to vector<8x768xf32>
    %133 = arith.mulf %131, %132 : vector<8x768xf32>
    %134 = arith.addf %128, %133 : vector<8x768xf32>
    %135 = vector.extract_strided_slice %105 {offsets = [0, 5], sizes = [8, 1], strides = [1, 1]} : vector<8x8xf32> to vector<8x1xf32>
    %136 = vector.extract_strided_slice %104 {offsets = [5, 0], sizes = [1, 768], strides = [1, 1]} : vector<8x768xf32> to vector<1x768xf32>
    %137 = vector.broadcast %135 : vector<8x1xf32> to vector<8x768xf32>
    %138 = vector.broadcast %136 : vector<1x768xf32> to vector<8x768xf32>
    %139 = arith.mulf %137, %138 : vector<8x768xf32>
    %140 = arith.addf %134, %139 : vector<8x768xf32>
    %141 = vector.extract_strided_slice %105 {offsets = [0, 6], sizes = [8, 1], strides = [1, 1]} : vector<8x8xf32> to vector<8x1xf32>
    %142 = vector.extract_strided_slice %104 {offsets = [6, 0], sizes = [1, 768], strides = [1, 1]} : vector<8x768xf32> to vector<1x768xf32>
    %143 = vector.broadcast %141 : vector<8x1xf32> to vector<8x768xf32>
    %144 = vector.broadcast %142 : vector<1x768xf32> to vector<8x768xf32>
    %145 = arith.mulf %143, %144 : vector<8x768xf32>
    %146 = arith.addf %140, %145 : vector<8x768xf32>
    %147 = vector.extract_strided_slice %105 {offsets = [0, 7], sizes = [8, 1], strides = [1, 1]} : vector<8x8xf32> to vector<8x1xf32>
    %148 = vector.extract_strided_slice %104 {offsets = [7, 0], sizes = [1, 768], strides = [1, 1]} : vector<8x768xf32> to vector<1x768xf32>
    %149 = vector.broadcast %147 : vector<8x1xf32> to vector<8x768xf32>
    %150 = vector.broadcast %148 : vector<1x768xf32> to vector<8x768xf32>
    %151 = arith.mulf %149, %150 : vector<8x768xf32>
    %152 = arith.addf %146, %151 : vector<8x768xf32>
    %c0_14 = arith.constant 0 : index
    %c0_15 = arith.constant 0 : index
    %153 = vector.load %arg8[%c0_14, %c0_15] : memref<8x1xf32, #tpu.memory_space<vmem>>, vector<8x1xf32>
    %154 = vector.broadcast %153 : vector<8x1xf32> to vector<8x768xf32>
    %155 = arith.addf %152, %154 : vector<8x768xf32>
    %cst_16 = arith.constant 0.000000e+00 : f32
    %156 = vector.broadcast %cst_16 : f32 to vector<8x768xf32>
    %157 = arith.maximumf %155, %156 : vector<8x768xf32>
    %c0_17 = arith.constant 0 : index
    %c0_18 = arith.constant 0 : index
    %c0_19 = arith.constant 0 : index
    %158 = vector.load %arg9[%c0_17, %c0_18, %c0_19] : memref<1x8x768xf32, #tpu.memory_space<vmem>>, vector<1x8x768xf32>
    %159 = vector.shape_cast %158 : vector<1x8x768xf32> to vector<8x768xf32>
    %160 = vector.shape_cast %157 : vector<8x768xf32> to vector<1x8x768xf32>
    tpu.vector_store %arg9[%c0_17, %c0_18, %c0_19], %160 {strides = array<i32>} : memref<1x8x768xf32, #tpu.memory_space<vmem>>, vector<1x8x768xf32>,
    return
  }
  func.func @transform_0(%arg0: i32) -> (i32, i32, i32) {
    %c0_i32 = arith.constant 0 : i32
    %c0_i32_0 = arith.constant 0 : i32
    %c0_i32_1 = arith.constant 0 : i32
    return %arg0, %c0_i32, %c0_i32_0 : i32, i32, i32
  }
  func.func @transform_1(%arg0: i32) -> (i32, i32) {
    %c0_i32 = arith.constant 0 : i32
    %c0_i32_0 = arith.constant 0 : i32
    %c0_i32_1 = arith.constant 0 : i32
    return %c0_i32, %c0_i32_0 : i32, i32
  }
  func.func @transform_2(%arg0: i32) -> (i32, i32) {
    %c0_i32 = arith.constant 0 : i32
    %c0_i32_0 = arith.constant 0 : i32
    %c0_i32_1 = arith.constant 0 : i32
    return %c0_i32, %c0_i32_0 : i32, i32
  }
  func.func @transform_3(%arg0: i32) -> (i32, i32) {
    %c0_i32 = arith.constant 0 : i32
    %c0_i32_0 = arith.constant 0 : i32
    %c0_i32_1 = arith.constant 0 : i32
    return %c0_i32, %c0_i32_0 : i32, i32
  }
  func.func @transform_4(%arg0: i32) -> (i32, i32) {
    %c0_i32 = arith.constant 0 : i32
    %c0_i32_0 = arith.constant 0 : i32
    %c0_i32_1 = arith.constant 0 : i32
    return %c0_i32, %c0_i32_0 : i32, i32
  }
  func.func @transform_5(%arg0: i32) -> (i32, i32) {
    %c0_i32 = arith.constant 0 : i32
    %c0_i32_0 = arith.constant 0 : i32
    %c0_i32_1 = arith.constant 0 : i32
    return %c0_i32, %c0_i32_0 : i32, i32
  }
  func.func @transform_6(%arg0: i32) -> (i32, i32) {
    %c0_i32 = arith.constant 0 : i32
    %c0_i32_0 = arith.constant 0 : i32
    %c0_i32_1 = arith.constant 0 : i32
    return %c0_i32, %c0_i32_0 : i32, i32
  }
  func.func @transform_7(%arg0: i32) -> (i32, i32) {
    %c0_i32 = arith.constant 0 : i32
    %c0_i32_0 = arith.constant 0 : i32
    %c0_i32_1 = arith.constant 0 : i32
    return %c0_i32, %c0_i32_0 : i32, i32
  }
  func.func @transform_8(%arg0: i32) -> (i32, i32, i32) {
    %c0_i32 = arith.constant 0 : i32
    %c0_i32_0 = arith.constant 0 : i32
    %c0_i32_1 = arith.constant 0 : i32
    return %arg0, %c0_i32, %c0_i32_0 : i32, i32, i32
  }
}

</mosaic_0001>

<bundles_post_ra>
// kernel: shuffle_unit_v2_s1.1
= control target key start
LH: loop header
LB: loop body
LE: loop exit
PB: predicated region body
PF: predicated region fallthrough
CT: control target
= control target key end

     0   :  { %v1897_v0 = vmov 0   ;;  %v1899_v1 = vmov 2   ;;  %v1895_v3 = vmov 1   ;;  %v1894_v4 = vmov 3   ;;  %s1109_s21 = smov 18   ;;  %s1110_s22 = smov 17   ;;  %s1882_s2 = inlined_call_operand.vmem [shape: f32[8,8], index: 2, kind: input, shape index: {}]   ;;  %s1883_s4 = inlined_call_operand.vmem [shape: f32[8,9], index: 4, kind: input, shape index: {}]   ;;  %s1884_s3 = inlined_call_operand.vmem [shape: f32[8,1], index: 3, kind: input, shape index: {}]   ;;  %s1885_s0 = inlined_call_operand.vmem [shape: f32[1,8,768], index: 0, kind: input, shape index: {}]   ;;  %s1886_s1 = inlined_call_operand.vmem [shape: f32[1,768], index: 1, kind: input, shape index: {}]   ;;  %s1887_s5 = inlined_call_operand.vmem [shape: f32[8,1], index: 5, kind: input, shape index: {}]   ;;  %s1888_s6 = inlined_call_operand.vmem [shape: f32[8,8], index: 6, kind: input, shape index: {}]   ;;  %s1889_s7 = inlined_call_operand.vmem [shape: f32[8,1], index: 7, kind: input, shape index: {}]   ;;  %s1890_s8 = inlined_call_operand.vmem [shape: f32[1,8,768], index: 8, kind: output, shape index: {}]  }
   0x1   :  { %1074 = vset.pattern.permute.xlu0 %v1897_v0  ;;  %1076 = vset.pattern.permute.xlu1 %v1899_v1  ;;  %v36_v2 = vld [vmem:[%s1882_s2] sm:$0xff]  ;;  %v1893_v6 = vmov 4   ;;  %v1892_v7 = vmov 6   ;;  %v1891_v8 = vmov 7   ;;  %v1898_v9 = vmov 5   ;;  %v1200_v16 = vld [vmem:[%s1885_s0 + $0x8] sm:$0xff] }
   0x2   :  { %39 = vperm.xlu0 %1074, %v36_v2   ;;  %113 = vperm.xlu1 %1076, %v36_v2   ;;  %v407_v5 = vld [vmem:[%s1883_s4] sm:$0xff]  ;;  %v1107_v10 = vmov 8   ;;  %v1896_v12 = vlaneseq  ;;  %v1205_v17 = vld [vmem:[%s1885_s0 + $0x10] sm:$0xff]  ;;  %v1213_v19 = vld [vmem:[%s1885_s0 + $0x18] sm:$0xff]  ;;  %s1111_s23 = smov 1   ;;  %s1112_s24 = smov 127  }
   0x3   :  { %v352_v11 = vld [vmem:[%s1884_s3] sm:$0xff]  ;;  %v1223_v21 = vld [vmem:[%s1885_s0 + $0x28] sm:$0xff]  ;;  %s1113_s25 = smov 111   ;;  %s1114_s26 = smov 110  }
   0x4   :  { %v1187_v13 = vshrl.u32 %v1896_v12, 7  ;;  %v1195_v15 = vld [vmem:[%s1885_s0] sm:$0xff]  ;;  %s1115_s27 = smov 109  }
   0x5   :  { %v1218_v20 = vld [vmem:[%s1885_s0 + $0x20] sm:$0xff] }
   0x6   :  { %1075 = vset.pattern.permute.xlu0 %v1895_v3  ;;  %1077 = vset.pattern.permute.xlu1 %v1894_v4  ;;  %v1190_v14 = vsub.s32 0, %v1187_v13  ;;  %v1208_v18 = vsub.s32 2, %v1187_v13  ;;  %v1226_v23 = vsub.s32 1, %v1187_v13  ;;  %v1229_v24 = vsub.s32 3, %v1187_v13 }
   0x7   :  { %73 = vperm.xlu0 %1075, %v36_v2   ;;  %153 = vperm.xlu1 %1077, %v36_v2   ;;  %v1238_v28 = vsub.s32 4, %v1187_v13  ;;  %v1271_v45 = vsub.s32 6, %v1187_v13  ;;  %v1288_v54 = vsub.s32 5, %v1187_v13 }
   0x8   :  { %v45_v25 = vrot.slane %v1195_v15, %v1190_v14  ;;  %v49_v26 = vrot.slane %v1200_v16, %v1190_v14  ;;  %v53_v27 = vrot.slane %v1205_v17, %v1190_v14  ;;  %v57_v29 = vrot.slane %v1213_v19, %v1190_v14 }
   0x9   :  { %v61_v30 = vrot.slane %v1218_v20, %v1190_v14  ;;  %v65_v31 = vrot.slane %v1223_v21, %v1190_v14  ;;  %v119_v32 = vrot.slane %v1195_v15, %v1208_v18  ;;  %v123_v33 = vrot.slane %v1200_v16, %v1208_v18 }
   0xa   :  { %v127_v34 = vrot.slane %v1205_v17, %v1208_v18  ;;  %v131_v35 = vrot.slane %v1213_v19, %v1208_v18  ;;  %v135_v36 = vrot.slane %v1218_v20, %v1208_v18  ;;  %v139_v37 = vrot.slane %v1223_v21, %v1208_v18 }
   0xb   :  { %476 = vperm.xlu0 %1075, %v407_v5   ;;  %1078 = vset.pattern.permute.xlu1 %v1893_v6  ;;  %v79_v38 = vrot.slane %v1195_v15, %v1226_v23  ;;  %v83_v39 = vrot.slane %v1200_v16, %v1226_v23  ;;  %v87_v40 = vrot.slane %v1205_v17, %v1226_v23 }
   0xc   :  { %193 = vperm.xlu1 %1078, %v36_v2   ;;  %v91_v42 = vrot.slane %v1213_v19, %v1226_v23  ;;  %v95_v43 = vrot.slane %v1218_v20, %v1226_v23  ;;  %v99_v44 = vrot.slane %v1223_v21, %v1226_v23  ;;  %v159_v47 = vrot.slane %v1195_v15, %v1229_v24 }
   0xd   :  { %v163_v48 = vrot.slane %v1200_v16, %v1229_v24  ;;  %v167_v49 = vrot.slane %v1205_v17, %v1229_v24  ;;  %v171_v50 = vrot.slane %v1213_v19, %v1229_v24  ;;  %v175_v51 = vrot.slane %v1218_v20, %v1229_v24 }
   0xe   :  { %v179_v52 = vrot.slane %v1223_v21, %v1229_v24  ;;  %v199_v53 = vrot.slane %v1195_v15, %v1238_v28  ;;  %v203_v55 = vrot.slane %v1200_v16, %v1238_v28 }
   0xf   :  { %1083 = vset.pattern.permute.xlu0 %v1899_v1 }
  0x10   :  { %511 = vperm.xlu0 %1083, %v407_v5   ;;  %1079 = vset.pattern.permute.xlu1 %v1892_v7 }
  0x11   :  { %273 = vperm.xlu1 %1079, %v36_v2  }
  0x14   :  { %1084 = vset.pattern.permute.xlu0 %v1894_v4  ;;  %v239_v4 = vrot.slane %v1195_v15, %v1288_v54 }
  0x15   :  { %546 = vperm.xlu0 %1084, %v407_v5   ;;  %1080 = vset.pattern.permute.xlu1 %v1891_v8 }
  0x16   :  { %313 = vperm.xlu1 %1080, %v36_v2  }
  0x19   :  { %1085 = vset.pattern.permute.xlu0 %v1898_v9 }
  0x1a   :  { %233 = vperm.xlu0 %1085, %v36_v2   ;;  %1081 = vset.pattern.permute.xlu1 %v1893_v6 }
  0x1b   :  { %410 = vperm.xlu1 %1081, %v407_v5  }
  0x1e   :  { %581 = vperm.xlu0 %1085, %v407_v5  }
  0x1f   :  { %1082 = vset.pattern.permute.xlu1 %v1897_v0 }
  0x20   :  { %441 = vperm.xlu1 %1082, %v407_v5  }
  0x22   :  { %1088 = vset.pattern.permute.xlu0 %v1107_v10 }
  0x23   :  { %686 = vperm.xlu0 %1088, %v407_v5  }
  0x24   :  { %1086 = vset.pattern.permute.xlu1 %v1892_v7 }
  0x25   :  { %616 = vperm.xlu1 %1086, %v407_v5  }
  0x27   :  { %1089 = vset.pattern.permute.xlu0 %v1897_v0 }
  0x28   :  { %355 = vperm.xlu0 %1089, %v352_v11  }
  0x29   :  { %1087 = vset.pattern.permute.xlu1 %v1891_v8 }
  0x2a   :  { %651 = vperm.xlu1 %1087, %v407_v5  }
  0x2e   :  { %1090 = vset.pattern.permute.xlu1 %v1897_v0 }
  0x7d   :  { %v40_v22 = vpop.permute.xlu0 %39  ;;  %v114_v46 = vpop.permute.xlu1 %113 }
  0x7e   :  { %v66_v3 = vmul.f32 %v45_v25, %v40_v22  ;;  %v67_v12 = vmul.f32 %v49_v26, %v40_v22  ;;  %v69_v1 = vmul.f32 %v57_v29, %v40_v22  ;;  %v70_v63 = vmul.f32 %v61_v30, %v40_v22 }
  0x7f   :  { %v71_v10 = vmul.f32 %v65_v31, %v40_v22  ;;  %v140_v62 = vmul.f32 %v119_v32, %v114_v46  ;;  %v141_v61 = vmul.f32 %v123_v33, %v114_v46  ;;  %v142_v60 = vmul.f32 %v127_v34, %v114_v46 }
  0x80   :  { %v143_v6 = vmul.f32 %v131_v35, %v114_v46  ;;  %v144_v56 = vmul.f32 %v135_v36, %v114_v46  ;;  %v145_v25 = vmul.f32 %v139_v37, %v114_v46 }
  0x82   :  { %v74_v41 = vpop.permute.xlu0 %73 }
  0x83   :  { %v100_v2 = vmul.f32 %v79_v38, %v74_v41  ;;  %v101_v5 = vmul.f32 %v83_v39, %v74_v41  ;;  %v102_v8 = vmul.f32 %v87_v40, %v74_v41  ;;  %v103_v7 = vmul.f32 %v91_v42, %v74_v41  ;;  %v154_v38 = vpop.permute.xlu1 %153 }
  0x84   :  { %v104_v0 = vmul.f32 %v95_v43, %v74_v41  ;;  %v105_v9 = vmul.f32 %v99_v44, %v74_v41  ;;  %v68_v39 = vmul.f32 %v53_v27, %v40_v22  ;;  %v243_v27 = vrot.slane %v1200_v16, %v1288_v54 }
  0x85   :  { %v106_v11 = vadd.f32 %v100_v2, %v66_v3  ;;  %v107_v40 = vadd.f32 %v101_v5, %v67_v12  ;;  %v109_v57 = vadd.f32 %v103_v7, %v69_v1  ;;  %v247_v22 = vrot.slane %v1205_v17, %v1288_v54 }
  0x86   :  { %v1298_v59 = vpop.permute.xlu0 %476  ;;  %v108_v58 = vadd.f32 %v102_v8, %v68_v39  ;;  %v110_v26 = vadd.f32 %v104_v0, %v70_v63  ;;  %v111_v43 = vadd.f32 %v105_v9, %v71_v10  ;;  %v251_v3 = vrot.slane %v1213_v19, %v1288_v54 }
  0x87   :  { %v1325_v12 = vsub.s32 7, %v1187_v13  ;;  %v146_v29 = vadd.f32 %v140_v62, %v106_v11  ;;  %v147_v30 = vadd.f32 %v141_v61, %v107_v40  ;;  %v180_v8 = vmul.f32 %v159_v47, %v154_v38  ;;  %v194_v7 = vpop.permute.xlu1 %193 }
  0x88   :  { %v181_v1 = vmul.f32 %v163_v48, %v154_v38  ;;  %v148_v31 = vadd.f32 %v142_v60, %v108_v58  ;;  %v149_v0 = vadd.f32 %v143_v6, %v109_v57  ;;  %v182_v9 = vmul.f32 %v167_v49, %v154_v38 }
  0x89   :  { %v183_v32 = vmul.f32 %v171_v50, %v154_v38  ;;  %v150_v34 = vadd.f32 %v144_v56, %v110_v26  ;;  %v151_v35 = vadd.f32 %v145_v25, %v111_v43  ;;  %v184_v36 = vmul.f32 %v175_v51, %v154_v38 }
  0x8a   :  { %v185_v37 = vmul.f32 %v179_v52, %v154_v38  ;;  %v255_v41 = vrot.slane %v1218_v20, %v1288_v54  ;;  %v259_v13 = vrot.slane %v1223_v21, %v1288_v54  ;;  %v319_v44 = vrot.slane %v1195_v15, %v1325_v12 }
  0x8b   :  { %v1316_v42 = vpop.permute.xlu0 %511  ;;  %v323_v6 = vrot.slane %v1200_v16, %v1325_v12  ;;  %v186_v46 = vadd.f32 %v180_v8, %v146_v29  ;;  %v187_v47 = vadd.f32 %v181_v1, %v147_v30  ;;  %v220_v48 = vmul.f32 %v199_v53, %v194_v7 }
  0x8c   :  { %v221_v49 = vmul.f32 %v203_v55, %v194_v7  ;;  %v274_v50 = vpop.permute.xlu1 %273  ;;  %v188_v51 = vadd.f32 %v182_v9, %v148_v31  ;;  %v189_v52 = vadd.f32 %v183_v32, %v149_v0  ;;  %v1900_v56 = vrot.slane %v1205_v17, %v1238_v28 }
  0x8d   :  { %v1901_v58 = vrot.slane %v1213_v19, %v1238_v28  ;;  %v190_v61 = vadd.f32 %v184_v36, %v150_v34  ;;  %v191_v62 = vadd.f32 %v185_v37, %v151_v35  ;;  %v327_v53 = vrot.slane %v1205_v17, %v1325_v12 }
  0x8e   :  { %v222_v57 = vmul.f32 %v1900_v56, %v194_v7  ;;  %v331_v55 = vrot.slane %v1213_v19, %v1325_v12  ;;  %v1902_v38 = vrot.slane %v1218_v20, %v1238_v28  ;;  %v1903_v40 = vrot.slane %v1223_v21, %v1238_v28 }
  0x8f   :  { %v223_v60 = vmul.f32 %v1901_v58, %v194_v7  ;;  %v226_v26 = vadd.f32 %v220_v48, %v186_v46  ;;  %v227_v43 = vadd.f32 %v221_v49, %v187_v47  ;;  %v1904_v8 = vrot.slane %v1195_v15, %v1271_v45 }
  0x90   :  { %v1327_v33 = vpop.permute.xlu0 %546  ;;  %v224_v39 = vmul.f32 %v1902_v38, %v194_v7  ;;  %v225_v25 = vmul.f32 %v1903_v40, %v194_v7  ;;  %v228_v29 = vadd.f32 %v222_v57, %v188_v51  ;;  %v1907_v31 = vrot.slane %v1213_v19, %v1271_v45 }
  0x91   :  { %v229_v30 = vadd.f32 %v223_v60, %v189_v52  ;;  %v300_v1 = vmul.f32 %v1904_v8, %v274_v50  ;;  %v314_v32 = vpop.permute.xlu1 %313  ;;  %v335_v47 = vrot.slane %v1218_v20, %v1325_v12  ;;  %v1908_v19 = vrot.slane %v1218_v20, %v1271_v45  ;;  %v35_v20 = vld [vmem:[%s1886_s1] sm:$0x3f]  ;;  %s1108_s1 = smov 19  }
  0x92   :  { %v303_v7 = vmul.f32 %v1907_v31, %v274_v50  ;;  %v230_v46 = vadd.f32 %v224_v39, %v190_v61  ;;  %v340_v49 = vmul.f32 %v319_v44, %v314_v32  ;;  %v341_v51 = vmul.f32 %v323_v6, %v314_v32 }
  0x93   :  { %v342_v57 = vmul.f32 %v327_v53, %v314_v32  ;;  %v343_v58 = vmul.f32 %v331_v55, %v314_v32  ;;  %v374_v55 = vrot.slane %v35_v20, %v1190_v14  ;;  %v378_v39 = vrot.slane %v35_v20, %v1226_v23 }
  0x95   :  { %v234_v63 = vpop.permute.xlu0 %233 }
  0x96   :  { %v260_v2 = vmul.f32 %v239_v4, %v234_v63  ;;  %v261_v5 = vmul.f32 %v243_v27, %v234_v63  ;;  %v262_v10 = vmul.f32 %v247_v22, %v234_v63  ;;  %v263_v11 = vmul.f32 %v251_v3, %v234_v63 }
  0x97   :  { %v1905_v4 = vrot.slane %v1200_v16, %v1271_v45  ;;  %v1906_v22 = vrot.slane %v1205_v17, %v1271_v45  ;;  %v264_v0 = vmul.f32 %v255_v41, %v234_v63  ;;  %v265_v9 = vmul.f32 %v259_v13, %v234_v63 }
  0x98   :  { %v266_v35 = vadd.f32 %v260_v2, %v226_v26  ;;  %v267_v15 = vadd.f32 %v261_v5, %v227_v43  ;;  %v268_v36 = vadd.f32 %v262_v10, %v228_v29  ;;  %v269_v37 = vadd.f32 %v263_v11, %v229_v30 }
  0x99   :  { %v301_v27 = vmul.f32 %v1905_v4, %v274_v50  ;;  %v302_v3 = vmul.f32 %v1906_v22, %v274_v50  ;;  %v1371_v34 = vpop.permute.xlu0 %581  ;;  %v231_v16 = vadd.f32 %v225_v25, %v191_v62  ;;  %v339_v17 = vrot.slane %v1223_v21, %v1325_v12 }
  0x9a   :  { %v304_v41 = vmul.f32 %v1908_v19, %v274_v50  ;;  %v1909_v13 = vrot.slane %v1223_v21, %v1271_v45  ;;  %v270_v52 = vadd.f32 %v264_v0, %v230_v46  ;;  %v306_v61 = vadd.f32 %v300_v1, %v266_v35  ;;  %v1456_v19 = vld [vmem:[%s1888_s6] sm:$0xff] }
  0x9b   :  { %v271_v56 = vadd.f32 %v265_v9, %v231_v16  ;;  %v307_v62 = vadd.f32 %v301_v27, %v267_v15  ;;  %v308_v63 = vadd.f32 %v302_v3, %v268_v36  ;;  %v309_v2 = vadd.f32 %v303_v7, %v269_v37 }
  0x9c   :  { %v305_v48 = vmul.f32 %v1909_v13, %v274_v50  ;;  %v344_v5 = vmul.f32 %v335_v47, %v314_v32  ;;  %v345_v10 = vmul.f32 %v339_v17, %v314_v32  ;;  %v310_v21 = vadd.f32 %v304_v41, %v270_v52  ;;  %v701_v17 = vld [vmem:[%s1887_s5] sm:$0xff] }
  0x9d   :  { %v346_v44 = vadd.f32 %v340_v49, %v306_v61  ;;  %v347_v6 = vadd.f32 %v341_v51, %v307_v62  ;;  %v348_v11 = vadd.f32 %v342_v57, %v308_v63  ;;  %v349_v38 = vadd.f32 %v343_v58, %v309_v2  ;;  %v1029_v49 = vld [vmem:[%s1889_s7] sm:$0xff] }
  0x9e   :  { %v1383_v60 = vpop.permute.xlu0 %686  ;;  %v311_v50 = vadd.f32 %v305_v48, %v271_v56  ;;  %v350_v29 = vadd.f32 %v344_v5, %v310_v21  ;;  %v382_v22 = vrot.slane %v35_v20, %v1208_v18  ;;  %v386_v3 = vrot.slane %v35_v20, %v1229_v24  ;;  %v411_v48 = vpop.permute.xlu1 %410 }
  0x9f   :  { %v390_v32 = vrot.slane %v35_v20, %v1238_v28  ;;  %v394_v35 = vrot.slane %v35_v20, %v1288_v54  ;;  %v1910_v41 = vmov 2   ;;  %v1911_v13 = vmov 5  }
  0xa0   :  { %v351_v30 = vadd.f32 %v345_v10, %v311_v50  ;;  %v1912_v51 = vmov 0   ;;  %v1913_v58 = vlaneseq  ;;  %v1914_v62 = vmov 1  }
  0xa2   :  { %v442_v52 = vpop.permute.xlu1 %441  ;;  %v1480_v61 = vand.u32 127, %v1913_v58 }
  0xa3   :  { %v356_v53 = vpop.permute.xlu0 %355 }
  0xa4   :  { %v358_v40 = vadd.f32 %v356_v53, %v346_v44  ;;  %v359_v25 = vadd.f32 %v356_v53, %v347_v6  ;;  %v360_v26 = vadd.f32 %v356_v53, %v348_v11  ;;  %v361_v43 = vadd.f32 %v356_v53, %v349_v38 }
  0xa5   :  { %v362_v4 = vadd.f32 %v356_v53, %v350_v29  ;;  %v363_v27 = vadd.f32 %v356_v53, %v351_v30  ;;  %vm433_vm0 = vcmp.lt.s32.totalorder %v1480_v61, 19  ;;  %vm468_vm1 = vcmp.lt.s32.totalorder %v1480_v61, 18 }
  0xa6   :  { %v364_v8 = vmax.f32 %v358_v40, 0.0  ;;  %v365_v1 = vmax.f32 %v359_v25, 0.0  ;;  %v366_v31 = vmax.f32 %v360_v26, 0.0  ;;  %v367_v7 = vmax.f32 %v361_v43, 0.0  ;;  %v1472_v56 = vpop.permute.xlu1 %616 }
  0xa7   :  { %v368_v15 = vmax.f32 %v362_v4, 0.0  ;;  %v369_v36 = vmax.f32 %v363_v27, 0.0  ;;  %v1915_v40 = vmov 3   ;;  %vm503_vm2 = vcmp.lt.s32.totalorder %v1480_v61, 17 }
  0xa8   :  { %v1392_v0 = vmul.f32 %v374_v55, %v364_v8  ;;  %v1394_v9 = vmul.f32 %v378_v39, %v365_v1  ;;  %v1400_v37 = vmul.f32 %v382_v22, %v366_v31  ;;  %v1402_v46 = vmul.f32 %v386_v3, %v367_v7 }
  0xa9   :  { %v1406_v16 = vmul.f32 %v390_v32, %v368_v15  ;;  %v1408_v47 = vmul.f32 %v394_v35, %v369_v36  ;;  %vm538_vm3 = vcmp.lt.s32.totalorder %v1480_v61, 1  ;;  %vm573_vm4 = vcmp.lt.s32.totalorder %v1480_v61, 127 }
  0xaa   :  { %421 = vrot.lane.b32.xlu0 %v1394_v9, %s1108_s1  ;;  %419 = vrot.lane.b32.xlu1 %v1392_v0, %s1108_s1  ;;  %v1477_v57 = vpop.permute.xlu1 %651  ;;  %v414_v5 = vmul.f32 %v411_v48, %v1394_v9  ;;  %v415_v38 = vmul.f32 %v411_v48, %v1400_v37  ;;  %v416_v53 = vmul.f32 %v411_v48, %v1402_v46  ;;  %vm608_vm5 = vcmp.lt.s32.totalorder %v1480_v61, 111 }
  0xab   :  { %v413_v29 = vmul.f32 %v411_v48, %v1392_v0  ;;  %v417_v1 = vmul.f32 %v411_v48, %v1406_v16  ;;  %v418_v3 = vmul.f32 %v411_v48, %v1408_v47  ;;  %vm643_vm6 = vcmp.lt.s32.totalorder %v1480_v61, 110 }
  0xac   :  { %vm678_vm7 = vcmp.lt.s32.totalorder %v1480_v61, 109 }
  0xae   :  { %425 = vrot.lane.b32.xlu0 %v1402_v46, %s1108_s1  ;;  %423 = vrot.lane.b32.xlu1 %v1400_v37, %s1108_s1 }
  0xb2   :  { %429 = vrot.lane.b32.xlu0 %v1408_v47, %s1108_s1  ;;  %427 = vrot.lane.b32.xlu1 %v1406_v16, %s1108_s1 }
  0xb6   :  { %456 = vrot.lane.b32.xlu0 %v1392_v0, %s1109_s21  ;;  %458 = vrot.lane.b32.xlu1 %v1394_v9, %s1109_s21 }
  0xba   :  { %460 = vrot.lane.b32.xlu0 %v1400_v37, %s1109_s21  ;;  %462 = vrot.lane.b32.xlu1 %v1402_v46, %s1109_s21 }
  0xbe   :  { %464 = vrot.lane.b32.xlu0 %v1406_v16, %s1109_s21  ;;  %466 = vrot.lane.b32.xlu1 %v1408_v47, %s1109_s21 }
  0xc2   :  { %495 = vrot.lane.b32.xlu0 %v1400_v37, %s1110_s22  ;;  %491 = vrot.lane.b32.xlu1 %v1392_v0, %s1110_s22 }
  0xc6   :  { %499 = vrot.lane.b32.xlu0 %v1406_v16, %s1110_s22  ;;  %493 = vrot.lane.b32.xlu1 %v1394_v9, %s1110_s22 }
  0xca   :  { %530 = vrot.lane.b32.xlu0 %v1400_v37, %s1111_s23  ;;  %497 = vrot.lane.b32.xlu1 %v1402_v46, %s1110_s22 }
  0xce   :  { %534 = vrot.lane.b32.xlu0 %v1406_v16, %s1111_s23  ;;  %501 = vrot.lane.b32.xlu1 %v1408_v47, %s1110_s22 }
  0xd2   :  { %565 = vrot.lane.b32.xlu0 %v1400_v37, %s1112_s24  ;;  %526 = vrot.lane.b32.xlu1 %v1392_v0, %s1111_s23 }
  0xd6   :  { %571 = vrot.lane.b32.xlu0 %v1408_v47, %s1112_s24  ;;  %528 = vrot.lane.b32.xlu1 %v1394_v9, %s1111_s23 }
  0xda   :  { %596 = vrot.lane.b32.xlu0 %v1392_v0, %s1113_s25  ;;  %532 = vrot.lane.b32.xlu1 %v1402_v46, %s1111_s23 }
  0xde   :  { %600 = vrot.lane.b32.xlu0 %v1400_v37, %s1113_s25  ;;  %536 = vrot.lane.b32.xlu1 %v1408_v47, %s1111_s23 }
  0xe2   :  { %604 = vrot.lane.b32.xlu0 %v1406_v16, %s1113_s25  ;;  %561 = vrot.lane.b32.xlu1 %v1392_v0, %s1112_s24 }
  0xe6   :  { %635 = vrot.lane.b32.xlu0 %v1400_v37, %s1114_s26  ;;  %563 = vrot.lane.b32.xlu1 %v1394_v9, %s1112_s24 }
  0xea   :  { %639 = vrot.lane.b32.xlu0 %v1406_v16, %s1114_s26  ;;  %567 = vrot.lane.b32.xlu1 %v1402_v46, %s1112_s24 }
  0xee   :  { %666 = vrot.lane.b32.xlu0 %v1392_v0, %s1115_s27  ;;  %569 = vrot.lane.b32.xlu1 %v1406_v16, %s1112_s24 }
  0xf2   :  { %670 = vrot.lane.b32.xlu0 %v1400_v37, %s1115_s27  ;;  %598 = vrot.lane.b32.xlu1 %v1394_v9, %s1113_s25 }
  0xf6   :  { %674 = vrot.lane.b32.xlu0 %v1406_v16, %s1115_s27  ;;  %602 = vrot.lane.b32.xlu1 %v1402_v46, %s1113_s25 }
  0xfa   :  { %704 = vperm.xlu0 %1089, %v701_v17   ;;  %606 = vrot.lane.b32.xlu1 %v1408_v47, %s1113_s25 }
  0xfe   :  { %631 = vrot.lane.b32.xlu1 %v1392_v0, %s1114_s26  ;;  %1092 = vset.pattern.permute.xlu0 %v1910_v41  ;;  %v1916_v0 = vmov 4   ;;  %v1917_v41 = vmov 6  }
  0xff   :  { %790 = vperm.xlu0 %1092, %v1456_v19  }
 0x102   :  { %633 = vrot.lane.b32.xlu1 %v1394_v9, %s1114_s26 }
 0x103   :  { %1095 = vset.pattern.permute.xlu0 %v1911_v13 }
 0x104   :  { %910 = vperm.xlu0 %1095, %v1456_v19  }
 0x106   :  { %637 = vrot.lane.b32.xlu1 %v1402_v46, %s1114_s26 }
 0x108   :  { %1098 = vset.pattern.permute.xlu0 %v1912_v51 }
 0x109   :  { %1032 = vperm.xlu0 %1098, %v1029_v49  }
 0x10a   :  { %641 = vrot.lane.b32.xlu1 %v1408_v47, %s1114_s26 }
 0x10e   :  { %668 = vrot.lane.b32.xlu1 %v1394_v9, %s1115_s27 }
 0x112   :  { %672 = vrot.lane.b32.xlu1 %v1402_v46, %s1115_s27 }
 0x116   :  { %716 = vperm.xlu1 %1090, %v1456_v19  }
 0x11a   :  { %676 = vrot.lane.b32.xlu1 %v1408_v47, %s1115_s27 }
 0x11b   :  { %1091 = vset.pattern.permute.xlu1 %v1914_v62 }
 0x11c   :  { %v422_v63 = vpop.permute.xlu0 %421  ;;  %v420_v2 = vpop.permute.xlu1 %419 }
 0x11d   :  { %v438_v20 = vsel %vm433_vm0, %v420_v2, %v422_v63 }
 0x11e   :  { %v445_v10 = vmul.f32 %v442_v52, %v438_v20  ;;  %750 = vperm.xlu1 %1091, %v1456_v19  }
 0x120   :  { %v451_v21 = vadd.f32 %v445_v10, %v414_v5  ;;  %v426_v50 = vpop.permute.xlu0 %425  ;;  %v424_v44 = vpop.permute.xlu1 %423  ;;  %v1918_v10 = vmov 7  }
 0x121   :  { %v436_v6 = vsel %vm433_vm0, %v424_v44, %v426_v50  ;;  %v437_v11 = vsel %vm433_vm0, %v422_v63, %v424_v44 }
 0x122   :  { %v446_v55 = vmul.f32 %v442_v52, %v437_v11  ;;  %v447_v39 = vmul.f32 %v442_v52, %v436_v6  ;;  %1093 = vset.pattern.permute.xlu1 %v1915_v40 }
 0x123   :  { %830 = vperm.xlu1 %1093, %v1456_v19  }
 0x124   :  { %v452_v25 = vadd.f32 %v446_v55, %v415_v38  ;;  %v453_v26 = vadd.f32 %v447_v39, %v416_v53  ;;  %v430_v43 = vpop.permute.xlu0 %429  ;;  %v428_v30 = vpop.permute.xlu1 %427 }
 0x125   :  { %v439_v8 = vsel %vm433_vm0, %v430_v43, %v420_v2  ;;  %v434_v4 = vsel %vm433_vm0, %v428_v30, %v430_v43  ;;  %v435_v27 = vsel %vm433_vm0, %v426_v50, %v428_v30 }
 0x126   :  { %v444_v22 = vmul.f32 %v442_v52, %v439_v8  ;;  %v448_v31 = vmul.f32 %v442_v52, %v435_v27  ;;  %v449_v7 = vmul.f32 %v442_v52, %v434_v4 }
 0x127   :  { %1094 = vset.pattern.permute.xlu1 %v1916_v0 }
 0x128   :  { %v450_v9 = vadd.f32 %v444_v22, %v413_v29  ;;  %v454_v32 = vadd.f32 %v448_v31, %v417_v1  ;;  %v455_v35 = vadd.f32 %v449_v7, %v418_v3  ;;  %v457_v15 = vpop.permute.xlu0 %456  ;;  %870 = vperm.xlu1 %1094, %v1456_v19   ;;  %v459_v36 = vpop.permute.xlu1 %458 }
 0x129   :  { %v473_v37 = vsel %vm468_vm1, %v457_v15, %v459_v36 }
 0x12a   :  { %v480_v46 = vmul.f32 %v1298_v59, %v473_v37 }
 0x12c   :  { %v486_v16 = vadd.f32 %v480_v46, %v451_v21  ;;  %v461_v17 = vpop.permute.xlu0 %460  ;;  %1096 = vset.pattern.permute.xlu1 %v1917_v41  ;;  %v463_v47 = vpop.permute.xlu1 %462 }
 0x12d   :  { %v472_v13 = vsel %vm468_vm1, %v459_v36, %v461_v17  ;;  %v471_v48 = vsel %vm468_vm1, %v461_v17, %v463_v47  ;;  %950 = vperm.xlu1 %1096, %v1456_v19  }
 0x12e   :  { %v481_v49 = vmul.f32 %v1298_v59, %v472_v13  ;;  %v482_v51 = vmul.f32 %v1298_v59, %v471_v48 }
 0x130   :  { %v487_v52 = vadd.f32 %v481_v49, %v452_v25  ;;  %v488_v58 = vadd.f32 %v482_v51, %v453_v26  ;;  %v465_v62 = vpop.permute.xlu0 %464  ;;  %v467_v63 = vpop.permute.xlu1 %466 }
 0x131   :  { %v470_v2 = vsel %vm468_vm1, %v463_v47, %v465_v62  ;;  %v469_v20 = vsel %vm468_vm1, %v465_v62, %v467_v63  ;;  %v474_v5 = vsel %vm468_vm1, %v467_v63, %v457_v15  ;;  %1097 = vset.pattern.permute.xlu1 %v1918_v10 }
 0x132   :  { %v483_v21 = vmul.f32 %v1298_v59, %v470_v2  ;;  %v479_v50 = vmul.f32 %v1298_v59, %v474_v5  ;;  %v484_v44 = vmul.f32 %v1298_v59, %v469_v20  ;;  %990 = vperm.xlu1 %1097, %v1456_v19  }
 0x134   :  { %v489_v6 = vadd.f32 %v483_v21, %v454_v32  ;;  %v485_v11 = vadd.f32 %v479_v50, %v450_v9  ;;  %v490_v38 = vadd.f32 %v484_v44, %v455_v35  ;;  %v496_v53 = vpop.permute.xlu0 %495  ;;  %v492_v55 = vpop.permute.xlu1 %491 }
 0x138   :  { %v500_v39 = vpop.permute.xlu0 %499  ;;  %v494_v40 = vpop.permute.xlu1 %493 }
 0x139   :  { %v507_v25 = vsel %vm503_vm2, %v494_v40, %v496_v53  ;;  %v508_v26 = vsel %vm503_vm2, %v492_v55, %v494_v40 }
 0x13a   :  { %v515_v43 = vmul.f32 %v1316_v42, %v508_v26  ;;  %v516_v59 = vmul.f32 %v1316_v42, %v507_v25 }
 0x13c   :  { %v521_v19 = vadd.f32 %v515_v43, %v486_v16  ;;  %v1539_v29 = vadd.f32 %v516_v59, %v487_v52  ;;  %v498_v30 = vpop.permute.xlu1 %497  ;;  %v531_v4 = vpop.permute.xlu0 %530 }
 0x13d   :  { %v505_v8 = vsel %vm503_vm2, %v498_v30, %v500_v39  ;;  %v506_v1 = vsel %vm503_vm2, %v496_v53, %v498_v30 }
 0x13e   :  { %v517_v27 = vmul.f32 %v1316_v42, %v506_v1  ;;  %v518_v22 = vmul.f32 %v1316_v42, %v505_v8 }
 0x140   :  { %v523_v3 = vadd.f32 %v517_v27, %v488_v58  ;;  %v1547_v31 = vadd.f32 %v518_v22, %v489_v6  ;;  %v502_v7 = vpop.permute.xlu1 %501  ;;  %v535_v15 = vpop.permute.xlu0 %534 }
 0x141   :  { %v504_v0 = vsel %vm503_vm2, %v500_v39, %v502_v7  ;;  %v509_v9 = vsel %vm503_vm2, %v502_v7, %v492_v55 }
 0x142   :  { %v514_v32 = vmul.f32 %v1316_v42, %v509_v9  ;;  %v519_v35 = vmul.f32 %v1316_v42, %v504_v0 }
 0x144   :  { %v520_v36 = vadd.f32 %v514_v32, %v485_v11  ;;  %v1555_v37 = vadd.f32 %v519_v35, %v490_v38  ;;  %v527_v46 = vpop.permute.xlu1 %526  ;;  %v566_v17 = vpop.permute.xlu0 %565 }
 0x148   :  { %v529_v16 = vpop.permute.xlu1 %528  ;;  %v1557_v47 = vpop.permute.xlu0 %571 }
 0x149   :  { %v543_v50 = vsel %vm538_vm3, %v527_v46, %v529_v16  ;;  %v542_v44 = vsel %vm538_vm3, %v529_v16, %v531_v4 }
 0x14a   :  { %v550_v53 = vmul.f32 %v1327_v33, %v543_v50  ;;  %v551_v40 = vmul.f32 %v1327_v33, %v542_v44 }
 0x14c   :  { %v533_v41 = vpop.permute.xlu1 %532  ;;  %v1559_v49 = vpop.permute.xlu0 %596 }
 0x14d   :  { %v541_v6 = vsel %vm538_vm3, %v531_v4, %v533_v41  ;;  %v540_v59 = vsel %vm538_vm3, %v533_v41, %v535_v15  ;;  %v556_v4 = vadd.f32 %v550_v53, %v521_v19  ;;  %v557_v19 = vadd.f32 %v551_v40, %v1539_v29 }
 0x14e   :  { %v552_v25 = vmul.f32 %v1327_v33, %v541_v6 }
 0x150   :  { %v537_v13 = vpop.permute.xlu1 %536  ;;  %v601_v52 = vpop.permute.xlu0 %600 }
 0x151   :  { %v544_v55 = vsel %vm538_vm3, %v537_v13, %v527_v46  ;;  %v539_v30 = vsel %vm538_vm3, %v535_v15, %v537_v13  ;;  %v553_v15 = vmul.f32 %v1327_v33, %v540_v59  ;;  %v558_v46 = vadd.f32 %v552_v25, %v523_v3 }
 0x152   :  { %v549_v8 = vmul.f32 %v1327_v33, %v544_v55  ;;  %v554_v16 = vmul.f32 %v1327_v33, %v539_v30 }
 0x154   :  { %v562_v48 = vpop.permute.xlu1 %561  ;;  %v1561_v63 = vpop.permute.xlu0 %604 }
 0x158   :  { %v564_v51 = vpop.permute.xlu1 %563  ;;  %v636_v2 = vpop.permute.xlu0 %635 }
 0x159   :  { %v578_v39 = vsel %vm573_vm4, %v562_v48, %v564_v51  ;;  %v577_v26 = vsel %vm573_vm4, %v564_v51, %v566_v17 }
 0x15a   :  { %v584_v27 = vmul.f32 %v1371_v34, %v578_v39  ;;  %v585_v7 = vmul.f32 %v1371_v34, %v577_v26 }
 0x15c   :  { %v568_v58 = vpop.permute.xlu1 %567  ;;  %v1565_v10 = vpop.permute.xlu0 %639  ;;  %v591_v44 = vadd.f32 %v585_v7, %v556_v4 }
 0x15d   :  { %v576_v43 = vsel %vm573_vm4, %v566_v17, %v568_v58  ;;  %v555_v17 = vadd.f32 %v549_v8, %v520_v36  ;;  %v579_v36 = vsel %vm573_vm4, %v1557_v47, %v562_v48 }
 0x15e   :  { %v586_v0 = vmul.f32 %v1371_v34, %v576_v43  ;;  %v589_v4 = vmul.f32 %v1371_v34, %v579_v36 }
 0x15f   :  { %v590_v50 = vadd.f32 %v584_v27, %v555_v17 }
 0x160   :  { %v570_v62 = vpop.permute.xlu1 %569  ;;  %v1576_v11 = vpop.permute.xlu0 %666  ;;  %v592_v6 = vadd.f32 %v586_v0, %v557_v19 }
 0x161   :  { %v575_v22 = vsel %vm573_vm4, %v568_v58, %v570_v62 }
 0x162   :  { %v587_v41 = vmul.f32 %v1371_v34, %v575_v22 }
 0x164   :  { %v599_v42 = vpop.permute.xlu1 %598  ;;  %v671_v9 = vpop.permute.xlu0 %670 }
 0x165   :  { %v612_v32 = vsel %vm608_vm5, %v599_v42, %v601_v52  ;;  %v613_v35 = vsel %vm608_vm5, %v1559_v49, %v599_v42 }
 0x166   :  { %v619_v42 = vmul.f32 %v1472_v56, %v613_v35  ;;  %v620_v29 = vmul.f32 %v1472_v56, %v612_v32 }
 0x168   :  { %v603_v20 = vpop.permute.xlu1 %602  ;;  %v1637_v48 = vpop.permute.xlu0 %674  ;;  %v625_v43 = vadd.f32 %v619_v42, %v590_v50  ;;  %v626_v59 = vadd.f32 %v620_v29, %v591_v44 }
 0x169   :  { %v610_v3 = vsel %vm608_vm5, %v603_v20, %v1561_v63  ;;  %v611_v33 = vsel %vm608_vm5, %v601_v52, %v603_v20  ;;  %v574_v52 = vsel %vm573_vm4, %v570_v62, %v1557_v47  ;;  %v593_v20 = vadd.f32 %v587_v41, %v558_v46 }
 0x16a   :  { %v621_v40 = vmul.f32 %v1472_v56, %v611_v33  ;;  %v622_v25 = vmul.f32 %v1472_v56, %v610_v3  ;;  %v588_v27 = vmul.f32 %v1371_v34, %v574_v52 }
 0x16c   :  { %v1563_v5 = vpop.permute.xlu1 %606  ;;  %v627_v0 = vadd.f32 %v621_v40, %v592_v6  ;;  %v628_v32 = vadd.f32 %v622_v25, %v593_v20 }
 0x16d   :  { %v609_v35 = vsel %vm608_vm5, %v1561_v63, %v1563_v5  ;;  %v614_v19 = vsel %vm608_vm5, %v1563_v5, %v1559_v49  ;;  %v559_v49 = vadd.f32 %v553_v15, %v1547_v31  ;;  %v560_v5 = vadd.f32 %v554_v16, %v1555_v37 }
 0x16e   :  { %v623_v33 = vmul.f32 %v1472_v56, %v609_v35  ;;  %v624_v36 = vmul.f32 %v1472_v56, %v614_v19 }
 0x16f   :  { %v595_v15 = vadd.f32 %v589_v4, %v560_v5  ;;  %v594_v56 = vadd.f32 %v588_v27, %v559_v49 }
 0x170   :  { %v1568_v21 = vpop.permute.xlu1 %631 }
 0x174   :  { %v634_v38 = vpop.permute.xlu1 %633 }
 0x175   :  { %v647_v13 = vsel %vm643_vm6, %v634_v38, %v636_v2  ;;  %v648_v51 = vsel %vm643_vm6, %v1568_v21, %v634_v38  ;;  %v1660_v46 = vpop.permute.xlu0 %704 }
 0x176   :  { %v654_v38 = vmul.f32 %v1477_v57, %v648_v51  ;;  %v655_v53 = vmul.f32 %v1477_v57, %v647_v13 }
 0x178   :  { %v638_v1 = vpop.permute.xlu1 %637  ;;  %v660_v22 = vadd.f32 %v654_v38, %v625_v43  ;;  %v661_v7 = vadd.f32 %v655_v53, %v626_v59 }
 0x179   :  { %v645_v55 = vsel %vm643_vm6, %v638_v1, %v1565_v10  ;;  %v646_v39 = vsel %vm643_vm6, %v636_v2, %v638_v1 }
 0x17a   :  { %v656_v8 = vmul.f32 %v1477_v57, %v646_v39  ;;  %v657_v47 = vmul.f32 %v1477_v57, %v645_v55  ;;  %v1679_v38 = vpop.permute.xlu0 %790  ;;  %v630_v55 = vadd.f32 %v624_v36, %v595_v15 }
 0x17c   :  { %v642_v58 = vpop.permute.xlu1 %641  ;;  %v662_v42 = vadd.f32 %v656_v8, %v627_v0  ;;  %v663_v29 = vadd.f32 %v657_v47, %v628_v32 }
 0x17d   :  { %v644_v50 = vsel %vm643_vm6, %v1565_v10, %v642_v58 }
 0x17e   :  { %v658_v16 = vmul.f32 %v1477_v57, %v644_v50 }
 0x17f   :  { %v1703_v40 = vpop.permute.xlu0 %910 }
 0x180   :  { %v669_v26 = vpop.permute.xlu1 %668 }
 0x181   :  { %v682_v30 = vsel %vm678_vm7, %v669_v26, %v671_v9  ;;  %v683_v2 = vsel %vm678_vm7, %v1576_v11, %v669_v26 }
 0x182   :  { %v689_v62 = vmul.f32 %v1383_v60, %v683_v2  ;;  %v690_v1 = vmul.f32 %v1383_v60, %v682_v30 }
 0x184   :  { %v673_v17 = vpop.permute.xlu1 %672  ;;  %v695_v41 = vadd.f32 %v689_v62, %v660_v22  ;;  %v696_v13 = vadd.f32 %v690_v1, %v661_v7 }
 0x185   :  { %v680_v34 = vsel %vm678_vm7, %v673_v17, %v1637_v48  ;;  %v681_v51 = vsel %vm678_vm7, %v671_v9, %v673_v17  ;;  %v649_v9 = vsel %vm643_vm6, %v642_v58, %v1568_v21  ;;  %v629_v58 = vadd.f32 %v623_v33, %v594_v56 }
 0x186   :  { %v691_v63 = vmul.f32 %v1383_v60, %v681_v51  ;;  %v692_v3 = vmul.f32 %v1383_v60, %v680_v34  ;;  %v1682_v31 = vadd.f32 %v1660_v46, %v695_v41  ;;  %v1685_v37 = vadd.f32 %v1660_v46, %v696_v13 }
 0x187   :  { %v659_v10 = vmul.f32 %v1477_v57, %v649_v9  ;;  %v664_v25 = vadd.f32 %v658_v16, %v629_v58 }
 0x188   :  { %v697_v44 = vadd.f32 %v691_v63, %v662_v42  ;;  %v698_v6 = vadd.f32 %v692_v3, %v663_v29  ;;  %v796_v39 = vrot.slane %v1682_v31, %v1208_v18  ;;  %v800_v52 = vrot.slane %v1685_v37, %v1208_v18 }
 0x189   :  { %v916_v20 = vrot.slane %v1682_v31, %v1288_v54  ;;  %v920_v57 = vrot.slane %v1685_v37, %v1288_v54  ;;  %v665_v26 = vadd.f32 %v659_v10, %v630_v55  ;;  %v726_v8 = vrot.slane %v1685_v37, %v1190_v14 }
 0x18a   :  { %v1690_v53 = vadd.f32 %v1660_v46, %v697_v44  ;;  %v1693_v21 = vadd.f32 %v1660_v46, %v698_v6  ;;  %v722_v47 = vrot.slane %v1682_v31, %v1190_v14  ;;  %v1718_v62 = vmul.f32 %v796_v39, %v1679_v38 }
 0x18b   :  { %v818_v1 = vmul.f32 %v800_v52, %v1679_v38  ;;  %v1722_v4 = vmul.f32 %v916_v20, %v1703_v40  ;;  %v1725_v27 = vmul.f32 %v920_v57, %v1703_v40  ;;  %v760_v32 = vrot.slane %v1685_v37, %v1226_v23 }
 0x18c   :  { %v804_v43 = vrot.slane %v1690_v53, %v1208_v18  ;;  %v808_v59 = vrot.slane %v1693_v21, %v1208_v18  ;;  %v924_v30 = vrot.slane %v1690_v53, %v1288_v54  ;;  %v928_v2 = vrot.slane %v1693_v21, %v1288_v54 }
 0x18d   :  { %v730_v7 = vrot.slane %v1690_v53, %v1190_v14  ;;  %v734_v0 = vrot.slane %v1693_v21, %v1190_v14  ;;  %v756_v35 = vrot.slane %v1682_v31, %v1226_v23  ;;  %v764_v41 = vrot.slane %v1690_v53, %v1226_v23 }
 0x18e   :  { %v819_v19 = vmul.f32 %v804_v43, %v1679_v38  ;;  %v820_v17 = vmul.f32 %v808_v59, %v1679_v38  ;;  %v768_v13 = vrot.slane %v1693_v21, %v1226_v23  ;;  %v1742_v34 = vmul.f32 %v924_v30, %v1703_v40 }
 0x18f   :  { %v1745_v51 = vmul.f32 %v928_v2, %v1703_v40  ;;  %v840_v42 = vrot.slane %v1685_v37, %v1229_v24  ;;  %v844_v29 = vrot.slane %v1690_v53, %v1229_v24  ;;  %v848_v3 = vrot.slane %v1693_v21, %v1229_v24 }
 0x190   :  { %v836_v49 = vrot.slane %v1682_v31, %v1229_v24  ;;  %v880_v5 = vrot.slane %v1685_v37, %v1238_v28  ;;  %v884_v33 = vrot.slane %v1690_v53, %v1238_v28  ;;  %v888_v9 = vrot.slane %v1693_v21, %v1238_v28 }
 0x191   :  { %v717_v22 = vpop.permute.xlu1 %716  ;;  %v876_v44 = vrot.slane %v1682_v31, %v1238_v28  ;;  %v960_v56 = vrot.slane %v1685_v37, %v1271_v45  ;;  %v968_v61 = vrot.slane %v1693_v21, %v1271_v45 }
 0x192   :  { %v743_v16 = vmul.f32 %v722_v47, %v717_v22  ;;  %v744_v10 = vmul.f32 %v726_v8, %v717_v22  ;;  %v745_v58 = vmul.f32 %v730_v7, %v717_v22  ;;  %v746_v55 = vmul.f32 %v734_v0, %v717_v22 }
 0x193   :  { %v1000_v8 = vrot.slane %v1685_v37, %v1325_v12  ;;  %v1004_v47 = vrot.slane %v1690_v53, %v1325_v12 }
 0x195   :  { %v677_v63 = vpop.permute.xlu1 %676 }
 0x196   :  { %v679_v36 = vsel %vm678_vm7, %v1637_v48, %v677_v63  ;;  %v684_v50 = vsel %vm678_vm7, %v677_v63, %v1576_v11  ;;  %v964_v48 = vrot.slane %v1690_v53, %v1271_v45  ;;  %v956_v11 = vrot.slane %v1682_v31, %v1271_v45 }
 0x197   :  { %v693_v6 = vmul.f32 %v1383_v60, %v679_v36  ;;  %v694_v15 = vmul.f32 %v1383_v60, %v684_v50 }
 0x199   :  { %v699_v39 = vadd.f32 %v693_v6, %v664_v25  ;;  %v700_v52 = vadd.f32 %v694_v15, %v665_v26  ;;  %v751_v20 = vpop.permute.xlu1 %750 }
 0x19a   :  { %v777_v60 = vmul.f32 %v756_v35, %v751_v20  ;;  %v778_v57 = vmul.f32 %v760_v32, %v751_v20  ;;  %v779_v43 = vmul.f32 %v764_v41, %v751_v20  ;;  %v780_v59 = vmul.f32 %v768_v13, %v751_v20 }
 0x19b   :  { %v1780_v30 = vadd.f32 %v1660_v46, %v699_v39  ;;  %v1783_v2 = vadd.f32 %v1660_v46, %v700_v52 }
 0x19c   :  { %v783_v7 = vadd.f32 %v777_v60, %v743_v16  ;;  %v784_v25 = vadd.f32 %v778_v57, %v744_v10  ;;  %v785_v26 = vadd.f32 %v779_v43, %v745_v58  ;;  %v786_v0 = vadd.f32 %v780_v59, %v746_v55 }
 0x19d   :  { %v738_v32 = vrot.slane %v1780_v30, %v1190_v14  ;;  %v742_v35 = vrot.slane %v1783_v2, %v1190_v14  ;;  %v772_v46 = vrot.slane %v1780_v30, %v1226_v23  ;;  %v776_v41 = vrot.slane %v1783_v2, %v1226_v23 }
 0x19e   :  { %v812_v13 = vrot.slane %v1780_v30, %v1208_v18  ;;  %v816_v63 = vrot.slane %v1783_v2, %v1208_v18  ;;  %v824_v36 = vadd.f32 %v818_v1, %v784_v25  ;;  %v825_v50 = vadd.f32 %v819_v19, %v785_v26  ;;  %v831_v6 = vpop.permute.xlu1 %830 }
 0x19f   :  { %v747_v15 = vmul.f32 %v738_v32, %v717_v22  ;;  %v748_v16 = vmul.f32 %v742_v35, %v717_v22  ;;  %v781_v10 = vmul.f32 %v772_v46, %v751_v20  ;;  %v782_v58 = vmul.f32 %v776_v41, %v751_v20 }
 0x1a0   :  { %v821_v14 = vmul.f32 %v812_v13, %v1679_v38  ;;  %v822_v55 = vmul.f32 %v816_v63, %v1679_v38  ;;  %v826_v39 = vadd.f32 %v820_v17, %v786_v0  ;;  %v852_v23 = vrot.slane %v1780_v30, %v1229_v24 }
 0x1a1   :  { %v787_v52 = vadd.f32 %v781_v10, %v747_v15  ;;  %v788_v60 = vadd.f32 %v782_v58, %v748_v16  ;;  %v856_v18 = vrot.slane %v1783_v2, %v1229_v24  ;;  %v823_v1 = vadd.f32 %v1718_v62, %v783_v7 }
 0x1a2   :  { %v857_v19 = vmul.f32 %v836_v49, %v831_v6  ;;  %v858_v57 = vmul.f32 %v840_v42, %v831_v6  ;;  %v859_v22 = vmul.f32 %v844_v29, %v831_v6  ;;  %v860_v43 = vmul.f32 %v848_v3, %v831_v6 }
 0x1a3   :  { %v827_v20 = vadd.f32 %v821_v14, %v787_v52  ;;  %v828_v59 = vadd.f32 %v822_v55, %v788_v60  ;;  %v861_v25 = vmul.f32 %v852_v23, %v831_v6  ;;  %v862_v26 = vmul.f32 %v856_v18, %v831_v6  ;;  %v871_v38 = vpop.permute.xlu1 %870 }
 0x1a4   :  { %v863_v17 = vadd.f32 %v857_v19, %v823_v1  ;;  %v864_v0 = vadd.f32 %v858_v57, %v824_v36  ;;  %v865_v32 = vadd.f32 %v859_v22, %v825_v50  ;;  %v866_v35 = vadd.f32 %v860_v43, %v826_v39 }
 0x1a5   :  { %v867_v46 = vadd.f32 %v861_v25, %v827_v20  ;;  %v868_v41 = vadd.f32 %v862_v26, %v828_v59  ;;  %v892_v24 = vrot.slane %v1780_v30, %v1238_v28  ;;  %v896_v62 = vrot.slane %v1783_v2, %v1238_v28  ;;  %v1033_v59 = vpop.permute.xlu0 %1032 }
 0x1a6   :  { %v897_v42 = vmul.f32 %v876_v44, %v871_v38  ;;  %v898_v29 = vmul.f32 %v880_v5, %v871_v38  ;;  %v899_v3 = vmul.f32 %v884_v33, %v871_v38  ;;  %v900_v49 = vmul.f32 %v888_v9, %v871_v38 }
 0x1a7   :  { %v901_v7 = vmul.f32 %v892_v24, %v871_v38  ;;  %v902_v13 = vmul.f32 %v896_v62, %v871_v38  ;;  %v1008_v63 = vrot.slane %v1693_v21, %v1325_v12  ;;  %v996_v44 = vrot.slane %v1682_v31, %v1325_v12 }
 0x1a8   :  { %v903_v36 = vadd.f32 %v897_v42, %v863_v17  ;;  %v904_v50 = vadd.f32 %v898_v29, %v864_v0  ;;  %v905_v6 = vadd.f32 %v899_v3, %v865_v32  ;;  %v906_v5 = vadd.f32 %v900_v49, %v866_v35  ;;  %v951_v15 = vpop.permute.xlu1 %950 }
 0x1a9   :  { %v907_v16 = vadd.f32 %v901_v7, %v867_v46  ;;  %v908_v10 = vadd.f32 %v902_v13, %v868_v41  ;;  %v972_v33 = vrot.slane %v1780_v30, %v1271_v45  ;;  %v976_v28 = vrot.slane %v1783_v2, %v1271_v45 }
 0x1aa   :  { %v977_v9 = vmul.f32 %v956_v11, %v951_v15  ;;  %v978_v58 = vmul.f32 %v960_v56, %v951_v15  ;;  %v979_v14 = vmul.f32 %v964_v48, %v951_v15  ;;  %v980_v55 = vmul.f32 %v968_v61, %v951_v15 }
 0x1ab   :  { %v981_v39 = vmul.f32 %v972_v33, %v951_v15  ;;  %v982_v23 = vmul.f32 %v976_v28, %v951_v15  ;;  %v932_v52 = vrot.slane %v1780_v30, %v1288_v54  ;;  %v936_v31 = vrot.slane %v1783_v2, %v1288_v54 }
 0x1ac   :  { %v943_v11 = vadd.f32 %v1722_v4, %v903_v36  ;;  %v944_v56 = vadd.f32 %v1725_v27, %v904_v50  ;;  %v945_v60 = vadd.f32 %v1742_v34, %v905_v6  ;;  %v946_v48 = vadd.f32 %v1745_v51, %v906_v5 }
 0x1ad   :  { %v1012_v45 = vrot.slane %v1780_v30, %v1325_v12  ;;  %v1016_v21 = vrot.slane %v1783_v2, %v1325_v12  ;;  %v991_v61 = vpop.permute.xlu1 %990  ;;  %v941_v18 = vmul.f32 %v932_v52, %v1703_v40  ;;  %v942_v1 = vmul.f32 %v936_v31, %v1703_v40 }
 0x1ae   :  { %v1017_v54 = vmul.f32 %v996_v44, %v991_v61  ;;  %v1018_v4 = vmul.f32 %v1000_v8, %v991_v61  ;;  %v1019_v27 = vmul.f32 %v1004_v47, %v991_v61  ;;  %v1020_v34 = vmul.f32 %v1008_v63, %v991_v61 }
 0x1af   :  { %v1021_v51 = vmul.f32 %v1012_v45, %v991_v61  ;;  %v1022_v30 = vmul.f32 %v1016_v21, %v991_v61  ;;  %v947_v19 = vadd.f32 %v941_v18, %v907_v16  ;;  %v948_v57 = vadd.f32 %v942_v1, %v908_v10 }
 0x1b0   :  { %v983_v2 = vadd.f32 %v977_v9, %v943_v11  ;;  %v984_v22 = vadd.f32 %v978_v58, %v944_v56  ;;  %v985_v43 = vadd.f32 %v979_v14, %v945_v60  ;;  %v986_v20 = vadd.f32 %v980_v55, %v946_v48 }
 0x1b1   :  { %v987_v40 = vadd.f32 %v981_v39, %v947_v19  ;;  %v988_v25 = vadd.f32 %v982_v23, %v948_v57 }
 0x1b2   :  { %v1023_v26 = vadd.f32 %v1017_v54, %v983_v2  ;;  %v1024_v38 = vadd.f32 %v1018_v4, %v984_v22  ;;  %v1025_v37 = vadd.f32 %v1019_v27, %v985_v43  ;;  %v1026_v8 = vadd.f32 %v1020_v34, %v986_v20 }
 0x1b3   :  { %v1027_v17 = vadd.f32 %v1021_v51, %v987_v40  ;;  %v1028_v0 = vadd.f32 %v1022_v30, %v988_v25 }
 0x1b4   :  { %v1035_v12 = vadd.f32 %v1033_v59, %v1023_v26  ;;  %v1036_v53 = vadd.f32 %v1033_v59, %v1024_v38  ;;  %v1037_v47 = vadd.f32 %v1033_v59, %v1025_v37  ;;  %v1038_v32 = vadd.f32 %v1033_v59, %v1026_v8 }
 0x1b5   :  { %v1039_v35 = vadd.f32 %v1033_v59, %v1027_v17  ;;  %v1040_v46 = vadd.f32 %v1033_v59, %v1028_v0 }
 0x1b6   :  { %v1041_v41 = vmax.f32 %v1035_v12, 0.0  ;;  %v1042_v24 = vmax.f32 %v1036_v53, 0.0  ;;  %v1043_v62 = vmax.f32 %v1037_v47, 0.0  ;;  %v1044_v42 = vmax.f32 %v1038_v32, 0.0 }
 0x1b7   :  { %v1045_v29 = vmax.f32 %v1039_v35, 0.0  ;;  %v1046_v3 = vmax.f32 %v1040_v46, 0.0 }
 0x1b8   :  { %1047 = vst [vmem:[%s1890_s8] sm:$0xff] %v1041_v41  ;;  %1048 = vst [vmem:[%s1890_s8 + $0x8] sm:$0xff] %v1042_v24 }
 0x1b9   :  { %1049 = vst [vmem:[%s1890_s8 + $0x10] sm:$0xff] %v1043_v62  ;;  %1050 = vst [vmem:[%s1890_s8 + $0x18] sm:$0xff] %v1044_v42 }
 0x1ba   :  { %1051 = vst [vmem:[%s1890_s8 + $0x20] sm:$0xff] %v1045_v29  ;;  %1052 = vst [vmem:[%s1890_s8 + $0x28] sm:$0xff] %v1046_v3 }

</bundles_post_ra>
